<compile_context>
chip_gen: v6e
topology: v6e:2x2x1
jax: 0.10.0
libtpu: 0.0.40
codegen_flags: <defaults>
</compile_context>

<pallas_src>
import math
from functools import partial

import jax
import jax.numpy as jnp
from jax.experimental import pallas as pl
from jax.experimental.pallas import tpu as pltpu


def _adaptive_bins(size, k):
    """PyTorch adaptive pooling bins: [floor(i*size/k), ceil((i+1)*size/k))."""
    return [
        (int(math.floor(i * size / k)), int(math.ceil((i + 1) * size / k)))
        for i in range(k)
    ]


def _spp_kernel(x_ref, o_ref, *, num_pools, mode, H, W):
    # x_ref: (TB, H, W, TC)  channels-last, C on lanes
    # o_ref: (TB, total, TC) one lane-dense row per bin
    ks = [int(math.isqrt(p)) for p in num_pools]
    k_fine = max(ks)
    h_fine = _adaptive_bins(H, k_fine)
    w_fine = _adaptive_bins(W, k_fine)
    exact_partition = (H % k_fine == 0) and (W % k_fine == 0)

    # ---- finest level: reduce the raw tile exactly once ----
    if mode == "max":
        fine = [[jnp.max(x_ref[:, hs:he, ws:we, :], axis=(1, 2))
                 for (ws, we) in w_fine] for (hs, he) in h_fine]
        fine_cnt = None
    else:  # avg: f32 accumulation, static reciprocal scaling
        fine = [[jnp.sum(x_ref[:, hs:he, ws:we, :].astype(jnp.float32), axis=(1, 2))
                 for (ws, we) in w_fine] for (hs, he) in h_fine]
        fine_cnt = [[(he - hs) * (we - ws) for (ws, we) in w_fine]
                    for (hs, he) in h_fine]

    row = 0
    for k in ks:
        # Coarse adaptive bins are exact unions of fine bins when k | k_fine
        # (always valid for max; for avg only when fine bins don't overlap).
        derivable = (k_fine % k == 0) and (mode == "max" or exact_partition)
        if k == k_fine:
            for i in range(k):
                for j in range(k):
                    if mode == "max":
                        v = fine[i][j]
                    else:
                        v = fine[i][j] * jnp.float32(1.0 / fine_cnt[i][j])
                    o_ref[:, row, :] = v.astype(o_ref.dtype)
                    row += 1
        elif derivable:
            r = k_fine // k
            for i in range(k):
                for j in range(k):
                    if mode == "max":
                        v = fine[i * r][j * r]
                        for a in range(r):
                            for b in range(r):
                                if a == 0 and b == 0:
                                    continue
                                v = jnp.maximum(v, fine[i * r + a][j * r + b])
                    else:
                        s = fine[i * r][j * r]
                        cnt = fine_cnt[i * r][j * r]
                        for a in range(r):
                            for b in range(r):
                                if a == 0 and b == 0:
                                    continue
                                s = s + fine[i * r + a][j * r + b]
                                cnt += fine_cnt[i * r + a][j * r + b]
                        v = s * jnp.float32(1.0 / cnt)
                    o_ref[:, row, :] = v.astype(o_ref.dtype)
                    row += 1
        else:
            # Fallback: direct reduction from the tile (non-divisible levels).
            for (hs, he) in _adaptive_bins(H, k):
                for (ws, we) in _adaptive_bins(W, k):
                    patch = x_ref[:, hs:he, ws:we, :]
                    if mode == "max":
                        v = jnp.max(patch, axis=(1, 2))
                    else:
                        cnt = (he - hs) * (we - ws)
                        v = jnp.sum(patch.astype(jnp.float32), axis=(1, 2))
                        v = v * jnp.float32(1.0 / cnt)
                    o_ref[:, row, :] = v.astype(o_ref.dtype)
                    row += 1


def spatial_pyramid_pooling(x, num_pools=(1, 4, 16), mode="max"):
    """x: (N, C, H, W) -> (N, C, sum(num_pools)), matching the PyTorch module."""
    N, C, H, W = x.shape
    for p in num_pools:
        s = math.isqrt(p)
        if s * s != p:
            raise ValueError(f"Bin size {p} is not a perfect square")
    if mode not in ("max", "avg"):
        raise NotImplementedError(
            f"Unknown pooling mode '{mode}', expected 'max' or 'avg'")
    total = sum(num_pools)
    itemsize = jnp.dtype(x.dtype).itemsize

    # Channels-last so C is lane-dense for both loads and stores.
    x_nhwc = jnp.transpose(x, (0, 2, 3, 1))  # (N, H, W, C)

    # Channel block: multiple of 128 when possible, sized to a VMEM-friendly tile.
    tile_budget = 4 * 1024 * 1024  # bytes per input tile (Pallas double-buffers)
    if C % 128 == 0:
        tc = 128
        for cand in range(C, 127, -128):
            if C % cand == 0 and cand * H * W * itemsize <= tile_budget:
                tc = cand
                break
    else:
        tc = C  # full-extent block satisfies the (8,128) rule

    # Batch block: amortize per-grid-step overhead for small feature maps.
    tb = 1
    per_row = H * W * tc * itemsize
    for cand in range(N, 0, -1):
        if N % cand == 0 and cand * per_row <= tile_budget:
            tb = cand
            break

    grid = (N // tb, C // tc)

    in_bytes = tb * H * W * tc * itemsize
    out_bytes = tb * total * tc * itemsize
    vmem_limit = int(min(64 * 1024 * 1024,
                         max(32 * 1024 * 1024,
                             2 * (in_bytes + out_bytes) + (4 << 20))))

    kernel = partial(_spp_kernel, num_pools=tuple(num_pools), mode=mode, H=H, W=W)
    out_nlc = pl.pallas_call(
        kernel,
        out_shape=jax.ShapeDtypeStruct((N, total, C), x.dtype),
        grid=grid,
        in_specs=[pl.BlockSpec((tb, H, W, tc), lambda n, c: (n, 0, 0, c))],
        out_specs=pl.BlockSpec((tb, total, tc), lambda n, c: (n, 0, c)),
        compiler_params=pltpu.CompilerParams(
            dimension_semantics=("parallel", "parallel"),
            vmem_limit_bytes=vmem_limit,
        ),
    )(x_nhwc)

    # Back to PyTorch layout (N, C, total); cheap XLA layout plumbing.
    return jnp.transpose(out_nlc, (0, 2, 1))


def _reference(x, num_pools=(1, 4, 16), mode="max"):
    """Pure-JAX reference (NCHW) mirroring nn.AdaptiveMax/AvgPool2d."""
    outs = []
    for p in num_pools:
        k = int(math.isqrt(p))
        vals = []
        for (hs, he) in _adaptive_bins(x.shape[2], k):
            for (ws, we) in _adaptive_bins(x.shape[3], k):
                patch = x[:, :, hs:he, ws:we]
                if mode == "max":
                    vals.append(jnp.max(patch, axis=(2, 3)))
                else:
                    vals.append(jnp.mean(patch, axis=(2, 3)))
        outs.append(jnp.stack(vals, axis=-1))
    return jnp.concatenate(outs, axis=2)


if __name__ == "__main__":
    key = jax.random.PRNGKey(0)
    x = jax.random.normal(key, (2, 4, 16, 16), dtype=jnp.float32)

    out = spatial_pyramid_pooling(x, num_pools=(1, 4, 16), mode="max")
    out = jax.block_until_ready(out)
    ref = _reference(x, num_pools=(1, 4, 16), mode="max")
    assert out.shape == (2, 4, 21), out.shape
    assert jnp.allclose(out, ref, atol=1e-6), "max mode mismatch vs reference"

    out_avg = jax.block_until_ready(
        spatial_pyramid_pooling(x, num_pools=(1, 4, 16), mode="avg"))
    ref_avg = _reference(x, num_pools=(1, 4, 16), mode="avg")
    assert jnp.allclose(out_avg, ref_avg, atol=1e-5), "avg mode mismatch vs reference"

    # Non-divisible spatial dims exercise overlapping adaptive bins + fallbacks.
    x2 = jax.random.normal(jax.random.split(key)[0], (2, 4, 10, 12), dtype=jnp.float32)
    out2 = jax.block_until_ready(spatial_pyramid_pooling(x2, mode="max"))
    ref2 = _reference(x2, mode="max")
    assert out2.shape == (2, 4, 21), out2.shape
    assert jnp.allclose(out2, ref2, atol=1e-6), "non-divisible spatial mismatch"

    print("KERNEL_OK")
</pallas_src>

<mosaic_0001>
module attributes {stable_mosaic.version = 11 : i64} {
  func.func @_spp_kernel(%arg0: i32, %arg1: i32, %arg2: memref<2x16x16x4xf32, #tpu.memory_space<vmem>>, %arg3: memref<2x21x4xf32, #tpu.memory_space<vmem>>) attributes {dimension_semantics = [#tpu.dimension_semantics<parallel>, #tpu.dimension_semantics<parallel>], iteration_bounds = array<i64: 1, 1>, scalar_prefetch = 0 : i64, scratch_operands = 0 : i64, tpu.core_type = #tpu.core_type<tc>, window_params = [{transform_indices = @transform_0, window_bounds = array<i64: 2, 16, 16, 4>}, {transform_indices = @transform_1, window_bounds = array<i64: 2, 21, 4>}]} {
    %c0 = arith.constant 0 : index
    %c0_0 = arith.constant 0 : index
    %c0_1 = arith.constant 0 : index
    %c0_2 = arith.constant 0 : index
    %0 = vector.load %arg2[%c0, %c0_0, %c0_1, %c0_2] : memref<2x16x16x4xf32, #tpu.memory_space<vmem>>, vector<2x4x4x4xf32>
    %cst = arith.constant dense<0xFF800000> : vector<2x4xf32>
    %1 = vector.multi_reduction <maximumf>, %0, %cst [1, 2] : vector<2x4x4x4xf32> to vector<2x4xf32>
    %c0_3 = arith.constant 0 : index
    %c0_4 = arith.constant 0 : index
    %c4 = arith.constant 4 : index
    %c0_5 = arith.constant 0 : index
    %2 = vector.load %arg2[%c0_3, %c0_4, %c4, %c0_5] : memref<2x16x16x4xf32, #tpu.memory_space<vmem>>, vector<2x4x4x4xf32>
    %cst_6 = arith.constant dense<0xFF800000> : vector<2x4xf32>
    %3 = vector.multi_reduction <maximumf>, %2, %cst_6 [1, 2] : vector<2x4x4x4xf32> to vector<2x4xf32>
    %c0_7 = arith.constant 0 : index
    %c0_8 = arith.constant 0 : index
    %c8 = arith.constant 8 : index
    %c0_9 = arith.constant 0 : index
    %4 = vector.load %arg2[%c0_7, %c0_8, %c8, %c0_9] : memref<2x16x16x4xf32, #tpu.memory_space<vmem>>, vector<2x4x4x4xf32>
    %cst_10 = arith.constant dense<0xFF800000> : vector<2x4xf32>
    %5 = vector.multi_reduction <maximumf>, %4, %cst_10 [1, 2] : vector<2x4x4x4xf32> to vector<2x4xf32>
    %c0_11 = arith.constant 0 : index
    %c0_12 = arith.constant 0 : index
    %c12 = arith.constant 12 : index
    %c0_13 = arith.constant 0 : index
    %6 = vector.load %arg2[%c0_11, %c0_12, %c12, %c0_13] : memref<2x16x16x4xf32, #tpu.memory_space<vmem>>, vector<2x4x4x4xf32>
    %cst_14 = arith.constant dense<0xFF800000> : vector<2x4xf32>
    %7 = vector.multi_reduction <maximumf>, %6, %cst_14 [1, 2] : vector<2x4x4x4xf32> to vector<2x4xf32>
    %c0_15 = arith.constant 0 : index
    %c4_16 = arith.constant 4 : index
    %c0_17 = arith.constant 0 : index
    %c0_18 = arith.constant 0 : index
    %8 = vector.load %arg2[%c0_15, %c4_16, %c0_17, %c0_18] : memref<2x16x16x4xf32, #tpu.memory_space<vmem>>, vector<2x4x4x4xf32>
    %cst_19 = arith.constant dense<0xFF800000> : vector<2x4xf32>
    %9 = vector.multi_reduction <maximumf>, %8, %cst_19 [1, 2] : vector<2x4x4x4xf32> to vector<2x4xf32>
    %c0_20 = arith.constant 0 : index
    %c4_21 = arith.constant 4 : index
    %c4_22 = arith.constant 4 : index
    %c0_23 = arith.constant 0 : index
    %10 = vector.load %arg2[%c0_20, %c4_21, %c4_22, %c0_23] : memref<2x16x16x4xf32, #tpu.memory_space<vmem>>, vector<2x4x4x4xf32>
    %cst_24 = arith.constant dense<0xFF800000> : vector<2x4xf32>
    %11 = vector.multi_reduction <maximumf>, %10, %cst_24 [1, 2] : vector<2x4x4x4xf32> to vector<2x4xf32>
    %c0_25 = arith.constant 0 : index
    %c4_26 = arith.constant 4 : index
    %c8_27 = arith.constant 8 : index
    %c0_28 = arith.constant 0 : index
    %12 = vector.load %arg2[%c0_25, %c4_26, %c8_27, %c0_28] : memref<2x16x16x4xf32, #tpu.memory_space<vmem>>, vector<2x4x4x4xf32>
    %cst_29 = arith.constant dense<0xFF800000> : vector<2x4xf32>
    %13 = vector.multi_reduction <maximumf>, %12, %cst_29 [1, 2] : vector<2x4x4x4xf32> to vector<2x4xf32>
    %c0_30 = arith.constant 0 : index
    %c4_31 = arith.constant 4 : index
    %c12_32 = arith.constant 12 : index
    %c0_33 = arith.constant 0 : index
    %14 = vector.load %arg2[%c0_30, %c4_31, %c12_32, %c0_33] : memref<2x16x16x4xf32, #tpu.memory_space<vmem>>, vector<2x4x4x4xf32>
    %cst_34 = arith.constant dense<0xFF800000> : vector<2x4xf32>
    %15 = vector.multi_reduction <maximumf>, %14, %cst_34 [1, 2] : vector<2x4x4x4xf32> to vector<2x4xf32>
    %c0_35 = arith.constant 0 : index
    %c8_36 = arith.constant 8 : index
    %c0_37 = arith.constant 0 : index
    %c0_38 = arith.constant 0 : index
    %16 = vector.load %arg2[%c0_35, %c8_36, %c0_37, %c0_38] : memref<2x16x16x4xf32, #tpu.memory_space<vmem>>, vector<2x4x4x4xf32>
    %cst_39 = arith.constant dense<0xFF800000> : vector<2x4xf32>
    %17 = vector.multi_reduction <maximumf>, %16, %cst_39 [1, 2] : vector<2x4x4x4xf32> to vector<2x4xf32>
    %c0_40 = arith.constant 0 : index
    %c8_41 = arith.constant 8 : index
    %c4_42 = arith.constant 4 : index
    %c0_43 = arith.constant 0 : index
    %18 = vector.load %arg2[%c0_40, %c8_41, %c4_42, %c0_43] : memref<2x16x16x4xf32, #tpu.memory_space<vmem>>, vector<2x4x4x4xf32>
    %cst_44 = arith.constant dense<0xFF800000> : vector<2x4xf32>
    %19 = vector.multi_reduction <maximumf>, %18, %cst_44 [1, 2] : vector<2x4x4x4xf32> to vector<2x4xf32>
    %c0_45 = arith.constant 0 : index
    %c8_46 = arith.constant 8 : index
    %c8_47 = arith.constant 8 : index
    %c0_48 = arith.constant 0 : index
    %20 = vector.load %arg2[%c0_45, %c8_46, %c8_47, %c0_48] : memref<2x16x16x4xf32, #tpu.memory_space<vmem>>, vector<2x4x4x4xf32>
    %cst_49 = arith.constant dense<0xFF800000> : vector<2x4xf32>
    %21 = vector.multi_reduction <maximumf>, %20, %cst_49 [1, 2] : vector<2x4x4x4xf32> to vector<2x4xf32>
    %c0_50 = arith.constant 0 : index
    %c8_51 = arith.constant 8 : index
    %c12_52 = arith.constant 12 : index
    %c0_53 = arith.constant 0 : index
    %22 = vector.load %arg2[%c0_50, %c8_51, %c12_52, %c0_53] : memref<2x16x16x4xf32, #tpu.memory_space<vmem>>, vector<2x4x4x4xf32>
    %cst_54 = arith.constant dense<0xFF800000> : vector<2x4xf32>
    %23 = vector.multi_reduction <maximumf>, %22, %cst_54 [1, 2] : vector<2x4x4x4xf32> to vector<2x4xf32>
    %c0_55 = arith.constant 0 : index
    %c12_56 = arith.constant 12 : index
    %c0_57 = arith.constant 0 : index
    %c0_58 = arith.constant 0 : index
    %24 = vector.load %arg2[%c0_55, %c12_56, %c0_57, %c0_58] : memref<2x16x16x4xf32, #tpu.memory_space<vmem>>, vector<2x4x4x4xf32>
    %cst_59 = arith.constant dense<0xFF800000> : vector<2x4xf32>
    %25 = vector.multi_reduction <maximumf>, %24, %cst_59 [1, 2] : vector<2x4x4x4xf32> to vector<2x4xf32>
    %c0_60 = arith.constant 0 : index
    %c12_61 = arith.constant 12 : index
    %c4_62 = arith.constant 4 : index
    %c0_63 = arith.constant 0 : index
    %26 = vector.load %arg2[%c0_60, %c12_61, %c4_62, %c0_63] : memref<2x16x16x4xf32, #tpu.memory_space<vmem>>, vector<2x4x4x4xf32>
    %cst_64 = arith.constant dense<0xFF800000> : vector<2x4xf32>
    %27 = vector.multi_reduction <maximumf>, %26, %cst_64 [1, 2] : vector<2x4x4x4xf32> to vector<2x4xf32>
    %c0_65 = arith.constant 0 : index
    %c12_66 = arith.constant 12 : index
    %c8_67 = arith.constant 8 : index
    %c0_68 = arith.constant 0 : index
    %28 = vector.load %arg2[%c0_65, %c12_66, %c8_67, %c0_68] : memref<2x16x16x4xf32, #tpu.memory_space<vmem>>, vector<2x4x4x4xf32>
    %cst_69 = arith.constant dense<0xFF800000> : vector<2x4xf32>
    %29 = vector.multi_reduction <maximumf>, %28, %cst_69 [1, 2] : vector<2x4x4x4xf32> to vector<2x4xf32>
    %c0_70 = arith.constant 0 : index
    %c12_71 = arith.constant 12 : index
    %c12_72 = arith.constant 12 : index
    %c0_73 = arith.constant 0 : index
    %30 = vector.load %arg2[%c0_70, %c12_71, %c12_72, %c0_73] : memref<2x16x16x4xf32, #tpu.memory_space<vmem>>, vector<2x4x4x4xf32>
    %cst_74 = arith.constant dense<0xFF800000> : vector<2x4xf32>
    %31 = vector.multi_reduction <maximumf>, %30, %cst_74 [1, 2] : vector<2x4x4x4xf32> to vector<2x4xf32>
    %32 = arith.maximumf %1, %3 : vector<2x4xf32>
    %33 = arith.maximumf %32, %5 : vector<2x4xf32>
    %34 = arith.maximumf %33, %7 : vector<2x4xf32>
    %35 = arith.maximumf %34, %9 : vector<2x4xf32>
    %36 = arith.maximumf %35, %11 : vector<2x4xf32>
    %37 = arith.maximumf %36, %13 : vector<2x4xf32>
    %38 = arith.maximumf %37, %15 : vector<2x4xf32>
    %39 = arith.maximumf %38, %17 : vector<2x4xf32>
    %40 = arith.maximumf %39, %19 : vector<2x4xf32>
    %41 = arith.maximumf %40, %21 : vector<2x4xf32>
    %42 = arith.maximumf %41, %23 : vector<2x4xf32>
    %43 = arith.maximumf %42, %25 : vector<2x4xf32>
    %44 = arith.maximumf %43, %27 : vector<2x4xf32>
    %45 = arith.maximumf %44, %29 : vector<2x4xf32>
    %46 = arith.maximumf %45, %31 : vector<2x4xf32>
    %c0_75 = arith.constant 0 : index
    %c0_76 = arith.constant 0 : index
    %c0_77 = arith.constant 0 : index
    %47 = vector.load %arg3[%c0_75, %c0_76, %c0_77] : memref<2x21x4xf32, #tpu.memory_space<vmem>>, vector<2x1x4xf32>
    %48 = vector.shape_cast %47 : vector<2x1x4xf32> to vector<2x4xf32>
    %49 = vector.shape_cast %46 : vector<2x4xf32> to vector<2x1x4xf32>
    tpu.vector_store %arg3[%c0_75, %c0_76, %c0_77], %49 {strides = array<i32>} : memref<2x21x4xf32, #tpu.memory_space<vmem>>, vector<2x1x4xf32>,
    %50 = arith.maximumf %1, %3 : vector<2x4xf32>
    %51 = arith.maximumf %50, %9 : vector<2x4xf32>
    %52 = arith.maximumf %51, %11 : vector<2x4xf32>
    %c0_78 = arith.constant 0 : index
    %c1 = arith.constant 1 : index
    %c0_79 = arith.constant 0 : index
    %53 = vector.load %arg3[%c0_78, %c1, %c0_79] : memref<2x21x4xf32, #tpu.memory_space<vmem>>, vector<2x1x4xf32>
    %54 = vector.shape_cast %53 : vector<2x1x4xf32> to vector<2x4xf32>
    %55 = vector.shape_cast %52 : vector<2x4xf32> to vector<2x1x4xf32>
    tpu.vector_store %arg3[%c0_78, %c1, %c0_79], %55 {strides = array<i32>} : memref<2x21x4xf32, #tpu.memory_space<vmem>>, vector<2x1x4xf32>,
    %56 = arith.maximumf %5, %7 : vector<2x4xf32>
    %57 = arith.maximumf %56, %13 : vector<2x4xf32>
    %58 = arith.maximumf %57, %15 : vector<2x4xf32>
    %c0_80 = arith.constant 0 : index
    %c2 = arith.constant 2 : index
    %c0_81 = arith.constant 0 : index
    %59 = vector.load %arg3[%c0_80, %c2, %c0_81] : memref<2x21x4xf32, #tpu.memory_space<vmem>>, vector<2x1x4xf32>
    %60 = vector.shape_cast %59 : vector<2x1x4xf32> to vector<2x4xf32>
    %61 = vector.shape_cast %58 : vector<2x4xf32> to vector<2x1x4xf32>
    tpu.vector_store %arg3[%c0_80, %c2, %c0_81], %61 {strides = array<i32>} : memref<2x21x4xf32, #tpu.memory_space<vmem>>, vector<2x1x4xf32>,
    %62 = arith.maximumf %17, %19 : vector<2x4xf32>
    %63 = arith.maximumf %62, %25 : vector<2x4xf32>
    %64 = arith.maximumf %63, %27 : vector<2x4xf32>
    %c0_82 = arith.constant 0 : index
    %c3 = arith.constant 3 : index
    %c0_83 = arith.constant 0 : index
    %65 = vector.load %arg3[%c0_82, %c3, %c0_83] : memref<2x21x4xf32, #tpu.memory_space<vmem>>, vector<2x1x4xf32>
    %66 = vector.shape_cast %65 : vector<2x1x4xf32> to vector<2x4xf32>
    %67 = vector.shape_cast %64 : vector<2x4xf32> to vector<2x1x4xf32>
    tpu.vector_store %arg3[%c0_82, %c3, %c0_83], %67 {strides = array<i32>} : memref<2x21x4xf32, #tpu.memory_space<vmem>>, vector<2x1x4xf32>,
    %68 = arith.maximumf %21, %23 : vector<2x4xf32>
    %69 = arith.maximumf %68, %29 : vector<2x4xf32>
    %70 = arith.maximumf %69, %31 : vector<2x4xf32>
    %c0_84 = arith.constant 0 : index
    %c4_85 = arith.constant 4 : index
    %c0_86 = arith.constant 0 : index
    %71 = vector.load %arg3[%c0_84, %c4_85, %c0_86] : memref<2x21x4xf32, #tpu.memory_space<vmem>>, vector<2x1x4xf32>
    %72 = vector.shape_cast %71 : vector<2x1x4xf32> to vector<2x4xf32>
    %73 = vector.shape_cast %70 : vector<2x4xf32> to vector<2x1x4xf32>
    tpu.vector_store %arg3[%c0_84, %c4_85, %c0_86], %73 {strides = array<i32>} : memref<2x21x4xf32, #tpu.memory_space<vmem>>, vector<2x1x4xf32>,
    %c0_87 = arith.constant 0 : index
    %c5 = arith.constant 5 : index
    %c0_88 = arith.constant 0 : index
    %74 = vector.load %arg3[%c0_87, %c5, %c0_88] : memref<2x21x4xf32, #tpu.memory_space<vmem>>, vector<2x1x4xf32>
    %75 = vector.shape_cast %74 : vector<2x1x4xf32> to vector<2x4xf32>
    %76 = vector.shape_cast %1 : vector<2x4xf32> to vector<2x1x4xf32>
    tpu.vector_store %arg3[%c0_87, %c5, %c0_88], %76 {strides = array<i32>} : memref<2x21x4xf32, #tpu.memory_space<vmem>>, vector<2x1x4xf32>,
    %c0_89 = arith.constant 0 : index
    %c6 = arith.constant 6 : index
    %c0_90 = arith.constant 0 : index
    %77 = vector.load %arg3[%c0_89, %c6, %c0_90] : memref<2x21x4xf32, #tpu.memory_space<vmem>>, vector<2x1x4xf32>
    %78 = vector.shape_cast %77 : vector<2x1x4xf32> to vector<2x4xf32>
    %79 = vector.shape_cast %3 : vector<2x4xf32> to vector<2x1x4xf32>
    tpu.vector_store %arg3[%c0_89, %c6, %c0_90], %79 {strides = array<i32>} : memref<2x21x4xf32, #tpu.memory_space<vmem>>, vector<2x1x4xf32>,
    %c0_91 = arith.constant 0 : index
    %c7 = arith.constant 7 : index
    %c0_92 = arith.constant 0 : index
    %80 = vector.load %arg3[%c0_91, %c7, %c0_92] : memref<2x21x4xf32, #tpu.memory_space<vmem>>, vector<2x1x4xf32>
    %81 = vector.shape_cast %80 : vector<2x1x4xf32> to vector<2x4xf32>
    %82 = vector.shape_cast %5 : vector<2x4xf32> to vector<2x1x4xf32>
    tpu.vector_store %arg3[%c0_91, %c7, %c0_92], %82 {strides = array<i32>} : memref<2x21x4xf32, #tpu.memory_space<vmem>>, vector<2x1x4xf32>,
    %c0_93 = arith.constant 0 : index
    %c8_94 = arith.constant 8 : index
    %c0_95 = arith.constant 0 : index
    %83 = vector.load %arg3[%c0_93, %c8_94, %c0_95] : memref<2x21x4xf32, #tpu.memory_space<vmem>>, vector<2x1x4xf32>
    %84 = vector.shape_cast %83 : vector<2x1x4xf32> to vector<2x4xf32>
    %85 = vector.shape_cast %7 : vector<2x4xf32> to vector<2x1x4xf32>
    tpu.vector_store %arg3[%c0_93, %c8_94, %c0_95], %85 {strides = array<i32>} : memref<2x21x4xf32, #tpu.memory_space<vmem>>, vector<2x1x4xf32>,
    %c0_96 = arith.constant 0 : index
    %c9 = arith.constant 9 : index
    %c0_97 = arith.constant 0 : index
    %86 = vector.load %arg3[%c0_96, %c9, %c0_97] : memref<2x21x4xf32, #tpu.memory_space<vmem>>, vector<2x1x4xf32>
    %87 = vector.shape_cast %86 : vector<2x1x4xf32> to vector<2x4xf32>
    %88 = vector.shape_cast %9 : vector<2x4xf32> to vector<2x1x4xf32>
    tpu.vector_store %arg3[%c0_96, %c9, %c0_97], %88 {strides = array<i32>} : memref<2x21x4xf32, #tpu.memory_space<vmem>>, vector<2x1x4xf32>,
    %c0_98 = arith.constant 0 : index
    %c10 = arith.constant 10 : index
    %c0_99 = arith.constant 0 : index
    %89 = vector.load %arg3[%c0_98, %c10, %c0_99] : memref<2x21x4xf32, #tpu.memory_space<vmem>>, vector<2x1x4xf32>
    %90 = vector.shape_cast %89 : vector<2x1x4xf32> to vector<2x4xf32>
    %91 = vector.shape_cast %11 : vector<2x4xf32> to vector<2x1x4xf32>
    tpu.vector_store %arg3[%c0_98, %c10, %c0_99], %91 {strides = array<i32>} : memref<2x21x4xf32, #tpu.memory_space<vmem>>, vector<2x1x4xf32>,
    %c0_100 = arith.constant 0 : index
    %c11 = arith.constant 11 : index
    %c0_101 = arith.constant 0 : index
    %92 = vector.load %arg3[%c0_100, %c11, %c0_101] : memref<2x21x4xf32, #tpu.memory_space<vmem>>, vector<2x1x4xf32>
    %93 = vector.shape_cast %92 : vector<2x1x4xf32> to vector<2x4xf32>
    %94 = vector.shape_cast %13 : vector<2x4xf32> to vector<2x1x4xf32>
    tpu.vector_store %arg3[%c0_100, %c11, %c0_101], %94 {strides = array<i32>} : memref<2x21x4xf32, #tpu.memory_space<vmem>>, vector<2x1x4xf32>,
    %c0_102 = arith.constant 0 : index
    %c12_103 = arith.constant 12 : index
    %c0_104 = arith.constant 0 : index
    %95 = vector.load %arg3[%c0_102, %c12_103, %c0_104] : memref<2x21x4xf32, #tpu.memory_space<vmem>>, vector<2x1x4xf32>
    %96 = vector.shape_cast %95 : vector<2x1x4xf32> to vector<2x4xf32>
    %97 = vector.shape_cast %15 : vector<2x4xf32> to vector<2x1x4xf32>
    tpu.vector_store %arg3[%c0_102, %c12_103, %c0_104], %97 {strides = array<i32>} : memref<2x21x4xf32, #tpu.memory_space<vmem>>, vector<2x1x4xf32>,
    %c0_105 = arith.constant 0 : index
    %c13 = arith.constant 13 : index
    %c0_106 = arith.constant 0 : index
    %98 = vector.load %arg3[%c0_105, %c13, %c0_106] : memref<2x21x4xf32, #tpu.memory_space<vmem>>, vector<2x1x4xf32>
    %99 = vector.shape_cast %98 : vector<2x1x4xf32> to vector<2x4xf32>
    %100 = vector.shape_cast %17 : vector<2x4xf32> to vector<2x1x4xf32>
    tpu.vector_store %arg3[%c0_105, %c13, %c0_106], %100 {strides = array<i32>} : memref<2x21x4xf32, #tpu.memory_space<vmem>>, vector<2x1x4xf32>,
    %c0_107 = arith.constant 0 : index
    %c14 = arith.constant 14 : index
    %c0_108 = arith.constant 0 : index
    %101 = vector.load %arg3[%c0_107, %c14, %c0_108] : memref<2x21x4xf32, #tpu.memory_space<vmem>>, vector<2x1x4xf32>
    %102 = vector.shape_cast %101 : vector<2x1x4xf32> to vector<2x4xf32>
    %103 = vector.shape_cast %19 : vector<2x4xf32> to vector<2x1x4xf32>
    tpu.vector_store %arg3[%c0_107, %c14, %c0_108], %103 {strides = array<i32>} : memref<2x21x4xf32, #tpu.memory_space<vmem>>, vector<2x1x4xf32>,
    %c0_109 = arith.constant 0 : index
    %c15 = arith.constant 15 : index
    %c0_110 = arith.constant 0 : index
    %104 = vector.load %arg3[%c0_109, %c15, %c0_110] : memref<2x21x4xf32, #tpu.memory_space<vmem>>, vector<2x1x4xf32>
    %105 = vector.shape_cast %104 : vector<2x1x4xf32> to vector<2x4xf32>
    %106 = vector.shape_cast %21 : vector<2x4xf32> to vector<2x1x4xf32>
    tpu.vector_store %arg3[%c0_109, %c15, %c0_110], %106 {strides = array<i32>} : memref<2x21x4xf32, #tpu.memory_space<vmem>>, vector<2x1x4xf32>,
    %c0_111 = arith.constant 0 : index
    %c16 = arith.constant 16 : index
    %c0_112 = arith.constant 0 : index
    %107 = vector.load %arg3[%c0_111, %c16, %c0_112] : memref<2x21x4xf32, #tpu.memory_space<vmem>>, vector<2x1x4xf32>
    %108 = vector.shape_cast %107 : vector<2x1x4xf32> to vector<2x4xf32>
    %109 = vector.shape_cast %23 : vector<2x4xf32> to vector<2x1x4xf32>
    tpu.vector_store %arg3[%c0_111, %c16, %c0_112], %109 {strides = array<i32>} : memref<2x21x4xf32, #tpu.memory_space<vmem>>, vector<2x1x4xf32>,
    %c0_113 = arith.constant 0 : index
    %c17 = arith.constant 17 : index
    %c0_114 = arith.constant 0 : index
    %110 = vector.load %arg3[%c0_113, %c17, %c0_114] : memref<2x21x4xf32, #tpu.memory_space<vmem>>, vector<2x1x4xf32>
    %111 = vector.shape_cast %110 : vector<2x1x4xf32> to vector<2x4xf32>
    %112 = vector.shape_cast %25 : vector<2x4xf32> to vector<2x1x4xf32>
    tpu.vector_store %arg3[%c0_113, %c17, %c0_114], %112 {strides = array<i32>} : memref<2x21x4xf32, #tpu.memory_space<vmem>>, vector<2x1x4xf32>,
    %c0_115 = arith.constant 0 : index
    %c18 = arith.constant 18 : index
    %c0_116 = arith.constant 0 : index
    %113 = vector.load %arg3[%c0_115, %c18, %c0_116] : memref<2x21x4xf32, #tpu.memory_space<vmem>>, vector<2x1x4xf32>
    %114 = vector.shape_cast %113 : vector<2x1x4xf32> to vector<2x4xf32>
    %115 = vector.shape_cast %27 : vector<2x4xf32> to vector<2x1x4xf32>
    tpu.vector_store %arg3[%c0_115, %c18, %c0_116], %115 {strides = array<i32>} : memref<2x21x4xf32, #tpu.memory_space<vmem>>, vector<2x1x4xf32>,
    %c0_117 = arith.constant 0 : index
    %c19 = arith.constant 19 : index
    %c0_118 = arith.constant 0 : index
    %116 = vector.load %arg3[%c0_117, %c19, %c0_118] : memref<2x21x4xf32, #tpu.memory_space<vmem>>, vector<2x1x4xf32>
    %117 = vector.shape_cast %116 : vector<2x1x4xf32> to vector<2x4xf32>
    %118 = vector.shape_cast %29 : vector<2x4xf32> to vector<2x1x4xf32>
    tpu.vector_store %arg3[%c0_117, %c19, %c0_118], %118 {strides = array<i32>} : memref<2x21x4xf32, #tpu.memory_space<vmem>>, vector<2x1x4xf32>,
    %c0_119 = arith.constant 0 : index
    %c20 = arith.constant 20 : index
    %c0_120 = arith.constant 0 : index
    %119 = vector.load %arg3[%c0_119, %c20, %c0_120] : memref<2x21x4xf32, #tpu.memory_space<vmem>>, vector<2x1x4xf32>
    %120 = vector.shape_cast %119 : vector<2x1x4xf32> to vector<2x4xf32>
    %121 = vector.shape_cast %31 : vector<2x4xf32> to vector<2x1x4xf32>
    tpu.vector_store %arg3[%c0_119, %c20, %c0_120], %121 {strides = array<i32>} : memref<2x21x4xf32, #tpu.memory_space<vmem>>, vector<2x1x4xf32>,
    return
  }
  func.func @transform_0(%arg0: i32, %arg1: i32) -> (i32, i32, i32, i32) {
    %c0_i32 = arith.constant 0 : i32
    %c0_i32_0 = arith.constant 0 : i32
    %c0_i32_1 = arith.constant 0 : i32
    return %arg0, %c0_i32, %c0_i32_0, %arg1 : i32, i32, i32, i32
  }
  func.func @transform_1(%arg0: i32, %arg1: i32) -> (i32, i32, i32) {
    %c0_i32 = arith.constant 0 : i32
    %c0_i32_0 = arith.constant 0 : i32
    return %arg0, %c0_i32, %arg1 : i32, i32, i32
  }
}

</mosaic_0001>

<bundles_post_ra>
// kernel: tpu_custom_call.1
= control target key start
LH: loop header
LB: loop body
LE: loop exit
PB: predicated region body
PF: predicated region fallthrough
CT: control target
= control target key end

     0   :  { %vm16_vm0 = vcmask 27648   ;;  %vm586_vm1 = vcmask 24576   ;;  %s1576_s0 = inlined_call_operand.vmem [shape: f32[2,16,16,4], index: 0, kind: input, shape index: {}]   ;;  %s1577_s1 = inlined_call_operand.vmem [shape: f32[2,21,4], index: 1, kind: output, shape index: {}]  }
   0x1   :  { %v8_v0 = vld [vmem:[%s1576_s0] sm:$0xf]  ;;  %v9_v1 = vld [vmem:[%s1576_s0 + $0x10] sm:$0xf]  ;;  %v43_v9 = vld [vmem:[%s1576_s0 + $0x4] sm:$0xf] }
   0x2   :  { %v10_v2 = vld [vmem:[%s1576_s0 + $0x20] sm:$0xf]  ;;  %v11_v3 = vld [vmem:[%s1576_s0 + $0x30] sm:$0xf]  ;;  %v17_v4 = vsel %vm16_vm0, %v8_v0, -inf  ;;  %v18_v5 = vsel %vm16_vm0, %v9_v1, -inf }
   0x3   :  { %v19_v6 = vsel %vm16_vm0, %v10_v2, -inf  ;;  %v21_v8 = vsel %vm16_vm0, %v11_v3, -inf  ;;  %v44_v10 = vld [vmem:[%s1576_s0 + $0x14] sm:$0xf]  ;;  %v45_v12 = vld [vmem:[%s1576_s0 + $0x24] sm:$0xf] }
   0x4   :  { %v20_v7 = vmax.f32 %v17_v4, %v19_v6  ;;  %v22_v11 = vmax.f32 %v18_v5, %v21_v8  ;;  %v46_v13 = vld [vmem:[%s1576_s0 + $0x34] sm:$0xf]  ;;  %v51_v14 = vsel %vm16_vm0, %v43_v9, -inf  ;;  %v52_v15 = vsel %vm16_vm0, %v44_v10, -inf  ;;  %v77_v18 = vld [vmem:[%s1576_s0 + $0x8] sm:$0xf] }
   0x5   :  { %v53_v16 = vsel %vm16_vm0, %v45_v12, -inf  ;;  %v55_v17 = vsel %vm16_vm0, %v46_v13, -inf  ;;  %v78_v19 = vld [vmem:[%s1576_s0 + $0x18] sm:$0xf]  ;;  %v79_v23 = vld [vmem:[%s1576_s0 + $0x28] sm:$0xf] }
   0x6   :  { %v23_v20 = vmax.f32 %v20_v7, %v22_v11  ;;  %v54_v21 = vmax.f32 %v51_v14, %v53_v16  ;;  %v56_v22 = vmax.f32 %v52_v15, %v55_v17  ;;  %v80_v24 = vld [vmem:[%s1576_s0 + $0x38] sm:$0xf]  ;;  %v85_v25 = vsel %vm16_vm0, %v77_v18, -inf  ;;  %v111_v29 = vld [vmem:[%s1576_s0 + $0xc] sm:$0xf] }
   0x7   :  { %v86_v26 = vsel %vm16_vm0, %v78_v19, -inf  ;;  %v87_v27 = vsel %vm16_vm0, %v79_v23, -inf  ;;  %v89_v28 = vsel %vm16_vm0, %v80_v24, -inf  ;;  %v112_v34 = vld [vmem:[%s1576_s0 + $0x1c] sm:$0xf]  ;;  %v119_v37 = vsel %vm16_vm0, %v111_v29, -inf }
   0x8   :  { %v24_v30 = vrot.slane %v23_v20, 4  ;;  %v57_v31 = vmax.f32 %v54_v21, %v56_v22  ;;  %v88_v32 = vmax.f32 %v85_v25, %v87_v27  ;;  %v90_v33 = vmax.f32 %v86_v26, %v89_v28  ;;  %v113_v35 = vld [vmem:[%s1576_s0 + $0x2c] sm:$0xf]  ;;  %v114_v36 = vld [vmem:[%s1576_s0 + $0x3c] sm:$0xf] }
   0x9   :  { %v120_v38 = vsel %vm16_vm0, %v112_v34, -inf  ;;  %v121_v39 = vsel %vm16_vm0, %v113_v35, -inf  ;;  %v655_v44 = vld [vmem:[%s1576_s0 + $0x40] sm:$0xf]  ;;  %v656_v45 = vld [vmem:[%s1576_s0 + $0x50] sm:$0xf] }
   0xa   :  { %v25_v40 = vmax.f32 %v23_v20, %v24_v30  ;;  %v58_v41 = vrot.slane %v57_v31, 4  ;;  %v91_v42 = vmax.f32 %v88_v32, %v90_v33  ;;  %v122_v43 = vmax.f32 %v119_v37, %v121_v39  ;;  %v657_v47 = vld [vmem:[%s1576_s0 + $0x60] sm:$0xf]  ;;  %v658_v48 = vld [vmem:[%s1576_s0 + $0x70] sm:$0xf] }
   0xb   :  { %v123_v46 = vsel %vm16_vm0, %v114_v36, -inf  ;;  %v154_v49 = vsel %vm16_vm0, %v655_v44, -inf  ;;  %v663_v54 = vld [vmem:[%s1576_s0 + $0x44] sm:$0xf]  ;;  %v664_v55 = vld [vmem:[%s1576_s0 + $0x54] sm:$0xf] }
   0xc   :  { %v26_v50 = vrot.slane %v25_v40, 2  ;;  %v59_v51 = vmax.f32 %v57_v31, %v58_v41  ;;  %v92_v52 = vrot.slane %v91_v42, 4  ;;  %v124_v53 = vmax.f32 %v120_v38, %v123_v46  ;;  %v665_v59 = vld [vmem:[%s1576_s0 + $0x64] sm:$0xf]  ;;  %v666_v1 = vld [vmem:[%s1576_s0 + $0x74] sm:$0xf] }
   0xd   :  { %v155_v56 = vsel %vm16_vm0, %v656_v45, -inf  ;;  %v156_v57 = vsel %vm16_vm0, %v657_v47, -inf  ;;  %v158_v58 = vsel %vm16_vm0, %v658_v48, -inf  ;;  %v188_v60 = vsel %vm16_vm0, %v663_v54, -inf  ;;  %v671_v2 = vld [vmem:[%s1576_s0 + $0x48] sm:$0xf] }
   0xe   :  { %v27_v61 = vmax.f32 %v25_v40, %v26_v50  ;;  %v60_v62 = vrot.slane %v59_v51, 2  ;;  %v93_v63 = vmax.f32 %v91_v42, %v92_v52  ;;  %v125_v0 = vmax.f32 %v122_v43, %v124_v53  ;;  %v672_v7 = vld [vmem:[%s1576_s0 + $0x58] sm:$0xf]  ;;  %v673_v12 = vld [vmem:[%s1576_s0 + $0x68] sm:$0xf] }
   0xf   :  { %v157_v3 = vmax.f32 %v154_v49, %v156_v57  ;;  %v159_v4 = vmax.f32 %v155_v56, %v158_v58  ;;  %v189_v5 = vsel %vm16_vm0, %v664_v55, -inf  ;;  %v190_v6 = vsel %vm16_vm0, %v665_v59, -inf  ;;  %v674_v21 = vld [vmem:[%s1576_s0 + $0x78] sm:$0xf]  ;;  %v679_v22 = vld [vmem:[%s1576_s0 + $0x4c] sm:$0xf] }
  0x10   :  { %v28_v8 = vrot.slane %v27_v61, 1  ;;  %v61_v9 = vmax.f32 %v59_v51, %v60_v62  ;;  %v94_v10 = vrot.slane %v93_v63, 2  ;;  %v126_v11 = vrot.slane %v125_v0, 4  ;;  %v680_v27 = vld [vmem:[%s1576_s0 + $0x5c] sm:$0xf] }
  0x11   :  { %v160_v13 = vmax.f32 %v157_v3, %v159_v4  ;;  %v191_v14 = vmax.f32 %v188_v60, %v190_v6  ;;  %v192_v15 = vsel %vm16_vm0, %v666_v1, -inf  ;;  %v222_v16 = vsel %vm16_vm0, %v671_v2, -inf  ;;  %v681_v32 = vld [vmem:[%s1576_s0 + $0x6c] sm:$0xf]  ;;  %v682_v33 = vld [vmem:[%s1576_s0 + $0x7c] sm:$0xf] }
  0x12   :  { %v867_v17 = vmax.f32 %v27_v61, %v28_v8  ;;  %v62_v18 = vrot.slane %v61_v9, 1  ;;  %v95_v19 = vmax.f32 %v93_v63, %v94_v10  ;;  %v127_v20 = vmax.f32 %v125_v0, %v126_v11  ;;  %v687_v42 = vld [vmem:[%s1576_s0 + $0x80] sm:$0xf]  ;;  %v688_v43 = vld [vmem:[%s1576_s0 + $0x90] sm:$0xf] }
  0x13   :  { %v161_v23 = vrot.slane %v160_v13, 4  ;;  %v193_v24 = vmax.f32 %v189_v5, %v192_v15  ;;  %v223_v25 = vsel %vm16_vm0, %v672_v7, -inf  ;;  %v224_v26 = vsel %vm16_vm0, %v673_v12, -inf  ;;  %v689_v48 = vld [vmem:[%s1576_s0 + $0xa0] sm:$0xf] }
  0x14   :  { %v880_v28 = vmax.f32 %v61_v9, %v62_v18  ;;  %v96_v29 = vrot.slane %v95_v19, 1  ;;  %v128_v30 = vrot.slane %v127_v20, 2  ;;  %v225_v31 = vmax.f32 %v222_v16, %v224_v26  ;;  %619 = vst.msk [vmem:[%s1577_s1 + $0x5] sm:$0x1] %vm586_vm1, %v867_v17  ;;  %v690_v53 = vld [vmem:[%s1576_s0 + $0xb0] sm:$0xf] }
  0x15   :  { %v162_v34 = vmax.f32 %v160_v13, %v161_v23  ;;  %v194_v35 = vmax.f32 %v191_v14, %v193_v24  ;;  %v226_v36 = vsel %vm16_vm0, %v674_v21, -inf  ;;  %v256_v37 = vsel %vm16_vm0, %v679_v22, -inf  ;;  %v695_v62 = vld [vmem:[%s1576_s0 + $0x84] sm:$0xf]  ;;  %v696_v63 = vld [vmem:[%s1576_s0 + $0x94] sm:$0xf] }
  0x16   :  { %v895_v38 = vmax.f32 %v95_v19, %v96_v29  ;;  %v129_v39 = vmax.f32 %v127_v20, %v128_v30  ;;  %v227_v40 = vmax.f32 %v223_v25, %v226_v36  ;;  %v257_v41 = vsel %vm16_vm0, %v680_v27, -inf  ;;  %621 = vst.msk [vmem:[%s1577_s1 + $0x6] sm:$0x1] %vm586_vm1, %v880_v28  ;;  %v697_v4 = vld [vmem:[%s1576_s0 + $0xa4] sm:$0xf] }
  0x17   :  { %v163_v44 = vrot.slane %v162_v34, 2  ;;  %v195_v45 = vrot.slane %v194_v35, 4  ;;  %v258_v46 = vsel %vm16_vm0, %v681_v32, -inf  ;;  %v260_v47 = vsel %vm16_vm0, %v682_v33, -inf  ;;  %v698_v9 = vld [vmem:[%s1576_s0 + $0xb4] sm:$0xf] }
  0x18   :  { %v130_v49 = vrot.slane %v129_v39, 1  ;;  %v228_v50 = vmax.f32 %v225_v31, %v227_v40  ;;  %v259_v51 = vmax.f32 %v256_v37, %v258_v46  ;;  %v261_v52 = vmax.f32 %v257_v41, %v260_v47  ;;  %623 = vst.msk [vmem:[%s1577_s1 + $0x7] sm:$0x1] %vm586_vm1, %v895_v38  ;;  %v703_v14 = vld [vmem:[%s1576_s0 + $0x88] sm:$0xf] }
  0x19   :  { %v164_v54 = vmax.f32 %v162_v34, %v163_v44  ;;  %v196_v55 = vmax.f32 %v194_v35, %v195_v45  ;;  %v291_v56 = vsel %vm16_vm0, %v687_v42, -inf  ;;  %v292_v57 = vsel %vm16_vm0, %v688_v43, -inf  ;;  %v704_v20 = vld [vmem:[%s1576_s0 + $0x98] sm:$0xf]  ;;  %v705_v21 = vld [vmem:[%s1576_s0 + $0xa8] sm:$0xf] }
  0x1a   :  { %v924_v58 = vmax.f32 %v129_v39, %v130_v49  ;;  %v229_v59 = vrot.slane %v228_v50, 4  ;;  %v262_v60 = vmax.f32 %v259_v51, %v261_v52  ;;  %v293_v61 = vsel %vm16_vm0, %v689_v48, -inf  ;;  %v706_v31 = vld [vmem:[%s1576_s0 + $0xb8] sm:$0xf]  ;;  %v711_v32 = vld [vmem:[%s1576_s0 + $0x8c] sm:$0xf] }
  0x1b   :  { %v165_v0 = vrot.slane %v164_v54, 1  ;;  %v197_v1 = vrot.slane %v196_v55, 2  ;;  %v294_v2 = vmax.f32 %v291_v56, %v293_v61  ;;  %v295_v3 = vsel %vm16_vm0, %v690_v53, -inf  ;;  %v712_v37 = vld [vmem:[%s1576_s0 + $0x9c] sm:$0xf] }
  0x1c   :  { %v558_v5 = vmax.f32 %v924_v58, %v895_v38  ;;  %v230_v6 = vmax.f32 %v228_v50, %v229_v59  ;;  %v263_v7 = vrot.slane %v262_v60, 4  ;;  %v296_v8 = vmax.f32 %v292_v57, %v295_v3  ;;  %625 = vst.msk [vmem:[%s1577_s1 + $0x8] sm:$0x1] %vm586_vm1, %v924_v58  ;;  %v713_v43 = vld [vmem:[%s1576_s0 + $0xac] sm:$0xf] }
  0x1d   :  { %v947_v10 = vmax.f32 %v164_v54, %v165_v0  ;;  %v198_v11 = vmax.f32 %v196_v55, %v197_v1  ;;  %v325_v12 = vsel %vm16_vm0, %v695_v62, -inf  ;;  %v326_v13 = vsel %vm16_vm0, %v696_v63, -inf  ;;  %v714_v44 = vld [vmem:[%s1576_s0 + $0xbc] sm:$0xf]  ;;  %v719_v53 = vld [vmem:[%s1576_s0 + $0xc0] sm:$0xf] }
  0x1e   :  { %v231_v15 = vrot.slane %v230_v6, 2  ;;  %v264_v16 = vmax.f32 %v262_v60, %v263_v7  ;;  %v297_v18 = vmax.f32 %v294_v2, %v296_v8  ;;  %v327_v19 = vsel %vm16_vm0, %v697_v4, -inf  ;;  %v720_v59 = vld [vmem:[%s1576_s0 + $0xd0] sm:$0xf]  ;;  %v721_v0 = vld [vmem:[%s1576_s0 + $0xe0] sm:$0xf] }
  0x1f   :  { %v560_v22 = vmax.f32 %v558_v5, %v947_v10  ;;  %v199_v23 = vrot.slane %v198_v11, 1  ;;  %v328_v24 = vmax.f32 %v325_v12, %v327_v19  ;;  %v329_v25 = vsel %vm16_vm0, %v698_v9, -inf  ;;  %627 = vst.msk [vmem:[%s1577_s1 + $0x9] sm:$0x1] %vm586_vm1, %v947_v10  ;;  %v722_v1 = vld [vmem:[%s1576_s0 + $0xf0] sm:$0xf] }
  0x20   :  { %v232_v26 = vmax.f32 %v230_v6, %v231_v15  ;;  %v265_v27 = vrot.slane %v264_v16, 2  ;;  %v298_v29 = vrot.slane %v297_v18, 4  ;;  %v330_v30 = vmax.f32 %v326_v13, %v329_v25  ;;  %v727_v6 = vld [vmem:[%s1576_s0 + $0xc4] sm:$0xf]  ;;  %v728_v12 = vld [vmem:[%s1576_s0 + $0xd4] sm:$0xf] }
  0x21   :  { %v974_v33 = vmax.f32 %v198_v11, %v199_v23  ;;  %v359_v34 = vsel %vm16_vm0, %v703_v14, -inf  ;;  %v360_v35 = vsel %vm16_vm0, %v704_v20, -inf  ;;  %v361_v36 = vsel %vm16_vm0, %v705_v21, -inf  ;;  %v730_v23 = vld [vmem:[%s1576_s0 + $0xf4] sm:$0xf] }
  0x22   :  { %v233_v39 = vrot.slane %v232_v26, 1  ;;  %v266_v40 = vmax.f32 %v264_v16, %v265_v27  ;;  %v299_v41 = vmax.f32 %v297_v18, %v298_v29  ;;  %v331_v42 = vmax.f32 %v328_v24, %v330_v30  ;;  %v729_v18 = vld [vmem:[%s1576_s0 + $0xe4] sm:$0xf]  ;;  %v735_v29 = vld [vmem:[%s1576_s0 + $0xc8] sm:$0xf] }
  0x23   :  { %v562_v45 = vmax.f32 %v560_v22, %v974_v33  ;;  %v362_v46 = vmax.f32 %v359_v34, %v361_v36  ;;  %v363_v47 = vsel %vm16_vm0, %v706_v31, -inf  ;;  %v393_v48 = vsel %vm16_vm0, %v711_v32, -inf  ;;  %629 = vst.msk [vmem:[%s1577_s1 + $0xa] sm:$0x1] %vm586_vm1, %v974_v33  ;;  %v737_v36 = vld [vmem:[%s1576_s0 + $0xe8] sm:$0xf] }
  0x24   :  { %v996_v49 = vmax.f32 %v232_v26, %v233_v39  ;;  %v267_v50 = vrot.slane %v266_v40, 1  ;;  %v300_v51 = vrot.slane %v299_v41, 2  ;;  %v332_v52 = vrot.slane %v331_v42, 4 }
  0x25   :  { %v364_v54 = vmax.f32 %v360_v35, %v363_v47  ;;  %v394_v55 = vsel %vm16_vm0, %v712_v37, -inf  ;;  %v395_v56 = vsel %vm16_vm0, %v713_v43, -inf  ;;  %v397_v57 = vsel %vm16_vm0, %v714_v44, -inf  ;;  %v736_v35 = vld [vmem:[%s1576_s0 + $0xd8] sm:$0xf] }
  0x26   :  { %v564_v60 = vmax.f32 %v562_v45, %v996_v49  ;;  %v1008_v61 = vmax.f32 %v266_v40, %v267_v50  ;;  %v301_v62 = vmax.f32 %v299_v41, %v300_v51  ;;  %v333_v63 = vmax.f32 %v331_v42, %v332_v52  ;;  %631 = vst.msk [vmem:[%s1577_s1 + $0xb] sm:$0x1] %vm586_vm1, %v996_v49  ;;  %v738_v45 = vld [vmem:[%s1576_s0 + $0xf8] sm:$0xf]  ;;  %v743_v47 = vld [vmem:[%s1576_s0 + $0xcc] sm:$0xf] }
  0x27   :  { %v365_v2 = vmax.f32 %v362_v46, %v364_v54  ;;  %v396_v3 = vmax.f32 %v393_v48, %v395_v56  ;;  %v398_v4 = vmax.f32 %v394_v55, %v397_v57  ;;  %v428_v5 = vsel %vm16_vm0, %v719_v53, -inf  ;;  %v744_v53 = vld [vmem:[%s1576_s0 + $0xdc] sm:$0xf] }
  0x28   :  { %v566_v7 = vmax.f32 %v564_v60, %v1008_v61  ;;  %v302_v8 = vrot.slane %v301_v62, 1  ;;  %v334_v9 = vrot.slane %v333_v63, 2  ;;  %v429_v11 = vsel %vm16_vm0, %v720_v59, -inf  ;;  %633 = vst.msk [vmem:[%s1577_s1 + $0xc] sm:$0x1] %vm586_vm1, %v1008_v61 }
  0x29   :  { %v366_v13 = vrot.slane %v365_v2, 4  ;;  %v399_v14 = vmax.f32 %v396_v3, %v398_v4  ;;  %v430_v15 = vsel %vm16_vm0, %v721_v0, -inf  ;;  %v432_v16 = vsel %vm16_vm0, %v722_v1, -inf  ;;  %v745_v59 = vld [vmem:[%s1576_s0 + $0xec] sm:$0xf] }
  0x2a   :  { %v1040_v19 = vmax.f32 %v301_v62, %v302_v8  ;;  %v335_v20 = vmax.f32 %v333_v63, %v334_v9  ;;  %v431_v21 = vmax.f32 %v428_v5, %v430_v15  ;;  %v433_v22 = vmax.f32 %v429_v11, %v432_v16  ;;  %v746_v60 = vld [vmem:[%s1576_s0 + $0xfc] sm:$0xf]  ;;  %v12_v11 = vld [vmem:[%s1576_s0 + $0x100] sm:$0xf]  ;;  %v13_v16 = vld [vmem:[%s1576_s0 + $0x110] sm:$0xf] }
  0x2b   :  { %v367_v24 = vmax.f32 %v365_v2, %v366_v13  ;;  %v400_v25 = vrot.slane %v399_v14, 4  ;;  %v462_v26 = vsel %vm16_vm0, %v727_v6, -inf  ;;  %v463_v27 = vsel %vm16_vm0, %v728_v12, -inf }
  0x2c   :  { %v568_v30 = vmax.f32 %v566_v7, %v1040_v19  ;;  %v336_v31 = vrot.slane %v335_v20, 1  ;;  %v434_v32 = vmax.f32 %v431_v21, %v433_v22  ;;  %v464_v34 = vsel %vm16_vm0, %v729_v18, -inf  ;;  %635 = vst.msk [vmem:[%s1577_s1 + $0xd] sm:$0x1] %vm586_vm1, %v1040_v19  ;;  %v14_v18 = vld [vmem:[%s1576_s0 + $0x120] sm:$0xf] }
  0x2d   :  { %v368_v37 = vrot.slane %v367_v24, 2  ;;  %v401_v39 = vmax.f32 %v399_v14, %v400_v25  ;;  %v465_v40 = vmax.f32 %v462_v26, %v464_v34  ;;  %v466_v41 = vsel %vm16_vm0, %v730_v23, -inf  ;;  %v47_v25 = vld [vmem:[%s1576_s0 + $0x104] sm:$0xf] }
  0x2e   :  { %v1064_v42 = vmax.f32 %v335_v20, %v336_v31  ;;  %v435_v43 = vrot.slane %v434_v32, 4  ;;  %v467_v44 = vmax.f32 %v463_v27, %v466_v41  ;;  %v496_v46 = vsel %vm16_vm0, %v735_v29, -inf  ;;  %v50_v41 = vld [vmem:[%s1576_s0 + $0x134] sm:$0xf] }
  0x2f   :  { %v369_v48 = vmax.f32 %v367_v24, %v368_v37  ;;  %v402_v50 = vrot.slane %v401_v39, 2  ;;  %v497_v51 = vsel %vm16_vm0, %v736_v35, -inf  ;;  %v498_v52 = vsel %vm16_vm0, %v737_v36, -inf  ;;  %v15_v24 = vld [vmem:[%s1576_s0 + $0x130] sm:$0xf] }
  0x30   :  { %v570_v54 = vmax.f32 %v568_v30, %v1064_v42  ;;  %v436_v55 = vmax.f32 %v434_v32, %v435_v43  ;;  %v468_v56 = vmax.f32 %v465_v40, %v467_v44  ;;  %v499_v57 = vmax.f32 %v496_v46, %v498_v52  ;;  %637 = vst.msk [vmem:[%s1577_s1 + $0xe] sm:$0x1] %vm586_vm1, %v1064_v42  ;;  %v49_v40 = vld [vmem:[%s1576_s0 + $0x124] sm:$0xf]  ;;  %v81_v43 = vld [vmem:[%s1576_s0 + $0x108] sm:$0xf] }
  0x31   :  { %v370_v62 = vrot.slane %v369_v48, 1  ;;  %v403_v63 = vmax.f32 %v401_v39, %v402_v50  ;;  %v500_v0 = vsel %vm16_vm0, %v738_v45, -inf  ;;  %v530_v1 = vsel %vm16_vm0, %v743_v47, -inf }
  0x32   :  { %v437_v2 = vrot.slane %v436_v55, 2  ;;  %v469_v3 = vrot.slane %v468_v56, 4  ;;  %v501_v4 = vmax.f32 %v497_v51, %v500_v0  ;;  %v531_v5 = vsel %vm16_vm0, %v744_v53, -inf  ;;  %v82_v53 = vld [vmem:[%s1576_s0 + $0x118] sm:$0xf] }
  0x33   :  { %v1093_v6 = vmax.f32 %v369_v48, %v370_v62  ;;  %v404_v7 = vrot.slane %v403_v63, 1  ;;  %v532_v8 = vsel %vm16_vm0, %v745_v59, -inf  ;;  %v534_v9 = vsel %vm16_vm0, %v746_v60, -inf }
  0x34   :  { %v438_v12 = vmax.f32 %v436_v55, %v437_v2  ;;  %v470_v13 = vmax.f32 %v468_v56, %v469_v3  ;;  %v502_v14 = vmax.f32 %v499_v57, %v501_v4  ;;  %v533_v15 = vmax.f32 %v530_v1, %v532_v8  ;;  %v84_v1 = vld [vmem:[%s1576_s0 + $0x138] sm:$0xf]  ;;  %v115_v2 = vld [vmem:[%s1576_s0 + $0x10c] sm:$0xf]  ;;  %v116_v8 = vld [vmem:[%s1576_s0 + $0x11c] sm:$0xf] }
  0x35   :  { %v572_v20 = vmax.f32 %v570_v54, %v1093_v6  ;;  %v1107_v21 = vmax.f32 %v403_v63, %v404_v7  ;;  %v535_v22 = vmax.f32 %v531_v5, %v534_v9  ;;  %v1111_v23 = vmax.f32 %v867_v17, %v880_v28  ;;  %639 = vst.msk [vmem:[%s1577_s1 + $0xf] sm:$0x1] %vm586_vm1, %v1093_v6  ;;  %v48_v28 = vld [vmem:[%s1576_s0 + $0x114] sm:$0xf]  ;;  %v83_v54 = vld [vmem:[%s1576_s0 + $0x128] sm:$0xf] }
  0x36   :  { %v439_v26 = vrot.slane %v438_v12, 1  ;;  %v471_v27 = vrot.slane %v470_v13, 2  ;;  %v503_v29 = vrot.slane %v502_v14, 4  ;;  %v30_v17 = vsel %vm16_vm0, %v12_v11, -inf }
  0x37   :  { %v574_v30 = vmax.f32 %v572_v20, %v1107_v21  ;;  %v536_v31 = vmax.f32 %v533_v15, %v535_v22  ;;  %641 = vst.msk [vmem:[%s1577_s1 + $0x10] sm:$0x1] %vm586_vm1, %v1107_v21  ;;  %v31_v32 = vsel %vm16_vm0, %v13_v16, -inf  ;;  %v32_v34 = vsel %vm16_vm0, %v14_v18, -inf  ;;  %v118_v15 = vld [vmem:[%s1576_s0 + $0x13c] sm:$0xf] }
  0x38   :  { %v1136_v35 = vmax.f32 %v438_v12, %v439_v26  ;;  %v472_v36 = vmax.f32 %v470_v13, %v471_v27  ;;  %v504_v37 = vmax.f32 %v502_v14, %v503_v29  ;;  %v33_v39 = vmax.f32 %v30_v17, %v32_v34  ;;  %v117_v14 = vld [vmem:[%s1576_s0 + $0x12c] sm:$0xf]  ;;  %v659_v29 = vld [vmem:[%s1576_s0 + $0x140] sm:$0xf]  ;;  %v660_v17 = vld [vmem:[%s1576_s0 + $0x150] sm:$0xf] }
  0x39   :  { %v537_v44 = vrot.slane %v536_v31, 4  ;;  %v34_v45 = vsel %vm16_vm0, %v15_v24, -inf  ;;  %v64_v46 = vsel %vm16_vm0, %v47_v25, -inf  ;;  %v65_v47 = vsel %vm16_vm0, %v48_v28, -inf  ;;  %v661_v34 = vld [vmem:[%s1576_s0 + $0x160] sm:$0xf] }
  0x3a   :  { %v576_v48 = vmax.f32 %v574_v30, %v1136_v35  ;;  %v473_v50 = vrot.slane %v472_v36, 1  ;;  %v505_v51 = vrot.slane %v504_v37, 2  ;;  %643 = vst.msk [vmem:[%s1577_s1 + $0x11] sm:$0x1] %vm586_vm1, %v1136_v35  ;;  %v35_v52 = vmax.f32 %v31_v32, %v34_v45  ;;  %v662_v45 = vld [vmem:[%s1576_s0 + $0x170] sm:$0xf] }
  0x3b   :  { %v538_v55 = vmax.f32 %v536_v31, %v537_v44  ;;  %v66_v56 = vsel %vm16_vm0, %v49_v40, -inf  ;;  %v68_v57 = vsel %vm16_vm0, %v50_v41, -inf  ;;  %v98_v59 = vsel %vm16_vm0, %v81_v43, -inf }
  0x3c   :  { %v1165_v60 = vmax.f32 %v472_v36, %v473_v50  ;;  %v506_v62 = vmax.f32 %v504_v37, %v505_v51  ;;  %v36_v63 = vmax.f32 %v33_v39, %v35_v52  ;;  %v67_v0 = vmax.f32 %v64_v46, %v66_v56 }
  0x3d   :  { %v539_v3 = vrot.slane %v538_v55, 2  ;;  %v69_v4 = vmax.f32 %v65_v47, %v68_v57  ;;  %v99_v5 = vsel %vm16_vm0, %v82_v53, -inf  ;;  %v100_v7 = vsel %vm16_vm0, %v83_v54, -inf  ;;  %v667_v47 = vld [vmem:[%s1576_s0 + $0x144] sm:$0xf] }
  0x3e   :  { %v578_v9 = vmax.f32 %v576_v48, %v1165_v60  ;;  %v507_v11 = vrot.slane %v506_v62, 1  ;;  %645 = vst.msk [vmem:[%s1577_s1 + $0x12] sm:$0x1] %vm586_vm1, %v1165_v60  ;;  %v37_v12 = vrot.slane %v36_v63, 4  ;;  %v101_v13 = vmax.f32 %v98_v59, %v100_v7  ;;  %v668_v57 = vld [vmem:[%s1576_s0 + $0x154] sm:$0xf] }
  0x3f   :  { %v540_v16 = vmax.f32 %v538_v55, %v539_v3  ;;  %v70_v18 = vmax.f32 %v67_v0, %v69_v4  ;;  %v102_v20 = vsel %vm16_vm0, %v84_v1, -inf  ;;  %v132_v22 = vsel %vm16_vm0, %v115_v2, -inf  ;;  %v669_v59 = vld [vmem:[%s1576_s0 + $0x164] sm:$0xf]  ;;  %v670_v1 = vld [vmem:[%s1576_s0 + $0x174] sm:$0xf] }
  0x40   :  { %v1192_v24 = vmax.f32 %v506_v62, %v507_v11  ;;  %v38_v25 = vmax.f32 %v36_v63, %v37_v12  ;;  %v103_v26 = vmax.f32 %v99_v5, %v102_v20  ;;  %v133_v27 = vsel %vm16_vm0, %v116_v8, -inf  ;;  %v675_v8 = vld [vmem:[%s1576_s0 + $0x148] sm:$0xf] }
  0x41   :  { %v541_v28 = vrot.slane %v540_v16, 1  ;;  %v71_v30 = vrot.slane %v70_v18, 4  ;;  %v134_v31 = vsel %vm16_vm0, %v117_v14, -inf  ;;  %v136_v32 = vsel %vm16_vm0, %v118_v15, -inf  ;;  %v677_v15 = vld [vmem:[%s1576_s0 + $0x168] sm:$0xf] }
  0x42   :  { %v580_v36 = vmax.f32 %v578_v9, %v1192_v24  ;;  %647 = vst.msk [vmem:[%s1577_s1 + $0x13] sm:$0x1] %vm586_vm1, %v1192_v24  ;;  %v39_v37 = vrot.slane %v38_v25, 2  ;;  %v104_v39 = vmax.f32 %v101_v13, %v103_v26  ;;  %v135_v40 = vmax.f32 %v132_v22, %v134_v31  ;;  %v676_v9 = vld [vmem:[%s1576_s0 + $0x158] sm:$0xf] }
  0x43   :  { %v1212_v41 = vmax.f32 %v540_v16, %v541_v28  ;;  %v72_v43 = vmax.f32 %v70_v18, %v71_v30  ;;  %v137_v44 = vmax.f32 %v133_v27, %v136_v32  ;;  %v167_v46 = vsel %vm16_vm0, %v659_v29, -inf  ;;  %v683_v26 = vld [vmem:[%s1576_s0 + $0x14c] sm:$0xf] }
  0x44   :  { %v40_v48 = vmax.f32 %v38_v25, %v39_v37  ;;  %v105_v50 = vrot.slane %v104_v39, 4  ;;  %v168_v51 = vsel %vm16_vm0, %v660_v17, -inf  ;;  %v169_v52 = vsel %vm16_vm0, %v661_v34, -inf  ;;  %v678_v25 = vld [vmem:[%s1576_s0 + $0x178] sm:$0xf] }
  0x45   :  { %v582_v53 = vmax.f32 %v580_v36, %v1212_v41  ;;  %649 = vst.msk [vmem:[%s1577_s1 + $0x14] sm:$0x1] %vm586_vm1, %v1212_v41  ;;  %v73_v54 = vrot.slane %v72_v43, 2  ;;  %v138_v55 = vmax.f32 %v135_v40, %v137_v44  ;;  %v170_v56 = vmax.f32 %v167_v46, %v169_v52  ;;  %v684_v36 = vld [vmem:[%s1576_s0 + $0x15c] sm:$0xf] }
  0x46   :  { %v41_v62 = vrot.slane %v40_v48, 1  ;;  %v106_v63 = vmax.f32 %v104_v39, %v105_v50  ;;  %v171_v0 = vsel %vm16_vm0, %v662_v45, -inf  ;;  %v201_v2 = vsel %vm16_vm0, %v667_v47, -inf  ;;  %v685_v37 = vld [vmem:[%s1576_s0 + $0x16c] sm:$0xf] }
  0x47   :  { %v584_v3 = vmax.f32 %v582_v53, %v1111_v23  ;;  %v74_v4 = vmax.f32 %v72_v43, %v73_v54  ;;  %v139_v5 = vrot.slane %v138_v55, 4  ;;  %v172_v7 = vmax.f32 %v168_v51, %v171_v0  ;;  %v686_v50 = vld [vmem:[%s1576_s0 + $0x17c] sm:$0xf]  ;;  %v691_v51 = vld [vmem:[%s1576_s0 + $0x180] sm:$0xf] }
  0x48   :  { %v1247_v11 = vmax.f32 %v40_v48, %v41_v62  ;;  %v107_v12 = vrot.slane %v106_v63, 2  ;;  %v202_v13 = vsel %vm16_vm0, %v668_v57, -inf  ;;  %v203_v14 = vsel %vm16_vm0, %v669_v59, -inf  ;;  %v692_v52 = vld [vmem:[%s1576_s0 + $0x190] sm:$0xf] }
  0x49   :  { %587 = vst.msk [vmem:[%s1577_s1] sm:$0x1] %vm586_vm1, %v584_v3  ;;  %v75_v16 = vrot.slane %v74_v4, 1  ;;  %v140_v18 = vmax.f32 %v138_v55, %v139_v5  ;;  %v173_v20 = vmax.f32 %v170_v56, %v172_v7  ;;  %v204_v22 = vmax.f32 %v201_v2, %v203_v14  ;;  %v693_v57 = vld [vmem:[%s1576_s0 + $0x1a0] sm:$0xf] }
  0x4a   :  { %v108_v27 = vmax.f32 %v106_v63, %v107_v12  ;;  %v205_v29 = vsel %vm16_vm0, %v670_v1, -inf  ;;  %v235_v17 = vsel %vm16_vm0, %v675_v8, -inf  ;;  %v236_v28 = vsel %vm16_vm0, %v676_v9, -inf  ;;  %620 = vst.msk [vmem:[%s1577_s1 + $0x1d] sm:$0x1] %vm586_vm1, %v1247_v11 }
  0x4b   :  { %v1272_v30 = vmax.f32 %v74_v4, %v75_v16  ;;  %v141_v31 = vrot.slane %v140_v18, 2  ;;  %v174_v32 = vrot.slane %v173_v20, 4  ;;  %v206_v34 = vmax.f32 %v202_v13, %v205_v29  ;;  %v694_v59 = vld [vmem:[%s1576_s0 + $0x1b0] sm:$0xf]  ;;  %v699_v2 = vld [vmem:[%s1576_s0 + $0x184] sm:$0xf] }
  0x4c   :  { %v109_v39 = vrot.slane %v108_v27, 1  ;;  %v237_v40 = vsel %vm16_vm0, %v677_v15, -inf  ;;  %v239_v43 = vsel %vm16_vm0, %v678_v25, -inf  ;;  %v269_v44 = vsel %vm16_vm0, %v683_v26, -inf  ;;  %v700_v14 = vld [vmem:[%s1576_s0 + $0x194] sm:$0xf] }
  0x4d   :  { %v142_v45 = vmax.f32 %v140_v18, %v141_v31  ;;  %v175_v46 = vmax.f32 %v173_v20, %v174_v32  ;;  %v207_v47 = vmax.f32 %v204_v22, %v206_v34  ;;  %v238_v48 = vmax.f32 %v235_v17, %v237_v40  ;;  %622 = vst.msk [vmem:[%s1577_s1 + $0x1e] sm:$0x1] %vm586_vm1, %v1272_v30  ;;  %v701_v20 = vld [vmem:[%s1576_s0 + $0x1a4] sm:$0xf]  ;;  %v702_v17 = vld [vmem:[%s1576_s0 + $0x1b4] sm:$0xf] }
  0x4e   :  { %v1297_v53 = vmax.f32 %v108_v27, %v109_v39  ;;  %v240_v54 = vmax.f32 %v236_v28, %v239_v43  ;;  %v270_v55 = vsel %vm16_vm0, %v684_v36, -inf  ;;  %v271_v56 = vsel %vm16_vm0, %v685_v37, -inf  ;;  %v707_v43 = vld [vmem:[%s1576_s0 + $0x188] sm:$0xf] }
  0x4f   :  { %v143_v62 = vrot.slane %v142_v45, 1  ;;  %v176_v63 = vrot.slane %v175_v46, 2  ;;  %v208_v0 = vrot.slane %v207_v47, 4  ;;  %v272_v1 = vmax.f32 %v269_v44, %v271_v56  ;;  %v708_v44 = vld [vmem:[%s1576_s0 + $0x198] sm:$0xf] }
  0x50   :  { %v241_v3 = vmax.f32 %v238_v48, %v240_v54  ;;  %v273_v4 = vsel %vm16_vm0, %v686_v50, -inf  ;;  %v304_v5 = vsel %vm16_vm0, %v691_v51, -inf  ;;  %v305_v7 = vsel %vm16_vm0, %v692_v52, -inf  ;;  %624 = vst.msk [vmem:[%s1577_s1 + $0x1f] sm:$0x1] %vm586_vm1, %v1297_v53 }
  0x51   :  { %v1318_v8 = vmax.f32 %v142_v45, %v143_v62  ;;  %v177_v9 = vmax.f32 %v175_v46, %v176_v63  ;;  %v209_v12 = vmax.f32 %v207_v47, %v208_v0  ;;  %v274_v13 = vmax.f32 %v270_v55, %v273_v4  ;;  %v709_v50 = vld [vmem:[%s1576_s0 + $0x1a8] sm:$0xf]  ;;  %v710_v56 = vld [vmem:[%s1576_s0 + $0x1b8] sm:$0xf]  ;;  %v715_v4 = vld [vmem:[%s1576_s0 + $0x18c] sm:$0xf] }
  0x52   :  { %v242_v15 = vrot.slane %v241_v3, 4  ;;  %v306_v16 = vsel %vm16_vm0, %v693_v57, -inf  ;;  %v308_v18 = vsel %vm16_vm0, %v694_v59, -inf  ;;  %v338_v22 = vsel %vm16_vm0, %v699_v2, -inf }
  0x53   :  { %v559_v25 = vmax.f32 %v1318_v8, %v1297_v53  ;;  %v178_v26 = vrot.slane %v177_v9, 1  ;;  %v210_v27 = vrot.slane %v209_v12, 2  ;;  %v275_v29 = vmax.f32 %v272_v1, %v274_v13  ;;  %626 = vst.msk [vmem:[%s1577_s1 + $0x20] sm:$0x1] %vm586_vm1, %v1318_v8 }
  0x54   :  { %v243_v28 = vmax.f32 %v241_v3, %v242_v15  ;;  %v307_v31 = vmax.f32 %v304_v5, %v306_v16  ;;  %v309_v32 = vmax.f32 %v305_v7, %v308_v18  ;;  %v339_v34 = vsel %vm16_vm0, %v700_v14, -inf  ;;  %v716_v5 = vld [vmem:[%s1576_s0 + $0x19c] sm:$0xf]  ;;  %v717_v14 = vld [vmem:[%s1576_s0 + $0x1ac] sm:$0xf] }
  0x55   :  { %v1340_v36 = vmax.f32 %v177_v9, %v178_v26  ;;  %v211_v37 = vmax.f32 %v209_v12, %v210_v27  ;;  %v276_v39 = vrot.slane %v275_v29, 4  ;;  %v340_v40 = vsel %vm16_vm0, %v701_v20, -inf }
  0x56   :  { %v244_v45 = vrot.slane %v243_v28, 2  ;;  %v310_v46 = vmax.f32 %v307_v31, %v309_v32  ;;  %v341_v47 = vmax.f32 %v338_v22, %v340_v40  ;;  %v342_v48 = vsel %vm16_vm0, %v702_v17, -inf  ;;  %v718_v22 = vld [vmem:[%s1576_s0 + $0x1bc] sm:$0xf]  ;;  %v723_v17 = vld [vmem:[%s1576_s0 + $0x1c0] sm:$0xf] }
  0x57   :  { %v561_v51 = vmax.f32 %v559_v25, %v1340_v36  ;;  %v212_v52 = vrot.slane %v211_v37, 1  ;;  %v277_v54 = vmax.f32 %v275_v29, %v276_v39  ;;  %v343_v55 = vmax.f32 %v339_v34, %v342_v48  ;;  %628 = vst.msk [vmem:[%s1577_s1 + $0x21] sm:$0x1] %vm586_vm1, %v1340_v36  ;;  %v725_v39 = vld [vmem:[%s1576_s0 + $0x1e0] sm:$0xf] }
  0x58   :  { %v245_v57 = vmax.f32 %v243_v28, %v244_v45  ;;  %v311_v59 = vrot.slane %v310_v46, 4  ;;  %v372_v62 = vsel %vm16_vm0, %v707_v43, -inf  ;;  %v373_v63 = vsel %vm16_vm0, %v708_v44, -inf }
  0x59   :  { %v1364_v0 = vmax.f32 %v211_v37, %v212_v52  ;;  %v278_v1 = vrot.slane %v277_v54, 2  ;;  %v344_v2 = vmax.f32 %v341_v47, %v343_v55  ;;  %v374_v3 = vsel %vm16_vm0, %v709_v50, -inf  ;;  %v724_v37 = vld [vmem:[%s1576_s0 + $0x1d0] sm:$0xf]  ;;  %v731_v52 = vld [vmem:[%s1576_s0 + $0x1c4] sm:$0xf] }
  0x5a   :  { %v246_v7 = vrot.slane %v245_v57, 1  ;;  %v312_v9 = vmax.f32 %v310_v46, %v311_v59  ;;  %v375_v12 = vmax.f32 %v372_v62, %v374_v3  ;;  %v376_v13 = vsel %vm16_vm0, %v710_v56, -inf  ;;  %v733_v3 = vld [vmem:[%s1576_s0 + $0x1e4] sm:$0xf] }
  0x5b   :  { %v563_v15 = vmax.f32 %v561_v51, %v1364_v0  ;;  %v279_v16 = vmax.f32 %v277_v54, %v278_v1  ;;  %v345_v18 = vrot.slane %v344_v2, 4  ;;  %v377_v20 = vmax.f32 %v373_v63, %v376_v13  ;;  %630 = vst.msk [vmem:[%s1577_s1 + $0x22] sm:$0x1] %vm586_vm1, %v1364_v0  ;;  %v726_v51 = vld [vmem:[%s1576_s0 + $0x1f0] sm:$0xf] }
  0x5c   :  { %v1386_v25 = vmax.f32 %v245_v57, %v246_v7  ;;  %v313_v26 = vrot.slane %v312_v9, 2  ;;  %v406_v27 = vsel %vm16_vm0, %v715_v4, -inf  ;;  %v407_v29 = vsel %vm16_vm0, %v716_v5, -inf  ;;  %v734_v4 = vld [vmem:[%s1576_s0 + $0x1f4] sm:$0xf] }
  0x5d   :  { %v280_v28 = vrot.slane %v279_v16, 1  ;;  %v346_v31 = vmax.f32 %v344_v2, %v345_v18  ;;  %v378_v32 = vmax.f32 %v375_v12, %v377_v20  ;;  %v408_v34 = vsel %vm16_vm0, %v717_v14, -inf  ;;  %v732_v2 = vld [vmem:[%s1576_s0 + $0x1d4] sm:$0xf]  ;;  %v739_v13 = vld [vmem:[%s1576_s0 + $0x1c8] sm:$0xf] }
  0x5e   :  { %v565_v40 = vmax.f32 %v563_v15, %v1386_v25  ;;  %v314_v43 = vmax.f32 %v312_v9, %v313_v26  ;;  %v409_v44 = vmax.f32 %v406_v27, %v408_v34  ;;  %v410_v45 = vsel %vm16_vm0, %v718_v22, -inf  ;;  %632 = vst.msk [vmem:[%s1577_s1 + $0x23] sm:$0x1] %vm586_vm1, %v1386_v25  ;;  %v740_v20 = vld [vmem:[%s1576_s0 + $0x1d8] sm:$0xf] }
  0x5f   :  { %v1407_v46 = vmax.f32 %v279_v16, %v280_v28  ;;  %v347_v47 = vrot.slane %v346_v31, 2  ;;  %v379_v48 = vrot.slane %v378_v32, 4  ;;  %v411_v50 = vmax.f32 %v407_v29, %v410_v45  ;;  %v741_v34 = vld [vmem:[%s1576_s0 + $0x1e8] sm:$0xf] }
  0x60   :  { %v315_v54 = vrot.slane %v314_v43, 1  ;;  %v441_v55 = vsel %vm16_vm0, %v723_v17, -inf  ;;  %v442_v56 = vsel %vm16_vm0, %v724_v37, -inf  ;;  %v443_v57 = vsel %vm16_vm0, %v725_v39, -inf  ;;  %v742_v37 = vld [vmem:[%s1576_s0 + $0x1f8] sm:$0xf] }
  0x61   :  { %v567_v59 = vmax.f32 %v565_v40, %v1407_v46  ;;  %v348_v62 = vmax.f32 %v346_v31, %v347_v47  ;;  %v380_v63 = vmax.f32 %v378_v32, %v379_v48  ;;  %v412_v1 = vmax.f32 %v409_v44, %v411_v50  ;;  %634 = vst.msk [vmem:[%s1577_s1 + $0x24] sm:$0x1] %vm586_vm1, %v1407_v46  ;;  %v747_v39 = vld [vmem:[%s1576_s0 + $0x1cc] sm:$0xf]  ;;  %v748_v47 = vld [vmem:[%s1576_s0 + $0x1dc] sm:$0xf] }
  0x62   :  { %v1433_v5 = vmax.f32 %v314_v43, %v315_v54  ;;  %v444_v7 = vmax.f32 %v441_v55, %v443_v57  ;;  %v445_v9 = vsel %vm16_vm0, %v726_v51, -inf  ;;  %v475_v12 = vsel %vm16_vm0, %v731_v52, -inf  ;;  %v749_v54 = vld [vmem:[%s1576_s0 + $0x1ec] sm:$0xf] }
  0x63   :  { %v349_v14 = vrot.slane %v348_v62, 1  ;;  %v381_v15 = vrot.slane %v380_v63, 2  ;;  %v413_v16 = vrot.slane %v412_v1, 4  ;;  %v446_v18 = vmax.f32 %v442_v56, %v445_v9 }
  0x64   :  { %v569_v22 = vmax.f32 %v567_v59, %v1433_v5  ;;  %v476_v26 = vsel %vm16_vm0, %v732_v2, -inf  ;;  %v477_v27 = vsel %vm16_vm0, %v733_v3, -inf  ;;  %v479_v29 = vsel %vm16_vm0, %v734_v4, -inf  ;;  %636 = vst.msk [vmem:[%s1577_s1 + $0x25] sm:$0x1] %vm586_vm1, %v1433_v5 }
  0x65   :  { %v1452_v17 = vmax.f32 %v348_v62, %v349_v14  ;;  %v382_v28 = vmax.f32 %v380_v63, %v381_v15  ;;  %v414_v31 = vmax.f32 %v412_v1, %v413_v16  ;;  %v447_v32 = vmax.f32 %v444_v7, %v446_v18  ;;  %v750_v3 = vld [vmem:[%s1576_s0 + $0x1fc] sm:$0xf] }
  0x66   :  { %v478_v40 = vmax.f32 %v475_v12, %v477_v27  ;;  %v480_v43 = vmax.f32 %v476_v26, %v479_v29  ;;  %v509_v44 = vsel %vm16_vm0, %v739_v13, -inf  ;;  %v510_v45 = vsel %vm16_vm0, %v740_v20, -inf }
  0x67   :  { %v571_v48 = vmax.f32 %v569_v22, %v1452_v17  ;;  %v383_v50 = vrot.slane %v382_v28, 1  ;;  %v415_v51 = vrot.slane %v414_v31, 2  ;;  %v448_v52 = vrot.slane %v447_v32, 4  ;;  %638 = vst.msk [vmem:[%s1577_s1 + $0x26] sm:$0x1] %vm586_vm1, %v1452_v17 }
  0x68   :  { %v481_v55 = vmax.f32 %v478_v40, %v480_v43  ;;  %v511_v56 = vsel %vm16_vm0, %v741_v34, -inf  ;;  %v513_v57 = vsel %vm16_vm0, %v742_v37, -inf  ;;  %v543_v59 = vsel %vm16_vm0, %v747_v39, -inf }
  0x69   :  { %v1480_v62 = vmax.f32 %v382_v28, %v383_v50  ;;  %v416_v63 = vmax.f32 %v414_v31, %v415_v51  ;;  %v449_v1 = vmax.f32 %v447_v32, %v448_v52  ;;  %v512_v2 = vmax.f32 %v509_v44, %v511_v56 }
  0x6a   :  { %v482_v4 = vrot.slane %v481_v55, 4  ;;  %v514_v7 = vmax.f32 %v510_v45, %v513_v57  ;;  %v544_v9 = vsel %vm16_vm0, %v748_v47, -inf  ;;  %v545_v12 = vsel %vm16_vm0, %v749_v54, -inf }
  0x6b   :  { %v573_v13 = vmax.f32 %v571_v48, %v1480_v62  ;;  %v417_v14 = vrot.slane %v416_v63, 1  ;;  %v450_v15 = vrot.slane %v449_v1, 2  ;;  %v546_v16 = vmax.f32 %v543_v59, %v545_v12  ;;  %640 = vst.msk [vmem:[%s1577_s1 + $0x27] sm:$0x1] %vm586_vm1, %v1480_v62 }
  0x6c   :  { %v483_v18 = vmax.f32 %v481_v55, %v482_v4  ;;  %v515_v20 = vmax.f32 %v512_v2, %v514_v7  ;;  %v547_v22 = vsel %vm16_vm0, %v750_v3, -inf  ;;  %v557_v26 = vmax.f32 %v1247_v11, %v1272_v30 }
  0x6d   :  { %v418_v27 = vmax.f32 %v416_v63, %v417_v14  ;;  %v451_v29 = vmax.f32 %v449_v1, %v450_v15  ;;  %v548_v28 = vmax.f32 %v544_v9, %v547_v22  ;;  %v589_v31 = vmax.f32 %v1111_v23, %v947_v10 }
  0x6e   :  { %v484_v32 = vrot.slane %v483_v18, 2  ;;  %v516_v34 = vrot.slane %v515_v20, 4  ;;  %v590_v37 = vmax.f32 %v557_v26, %v1340_v36  ;;  %v595_v39 = vmax.f32 %v895_v38, %v924_v58 }
  0x6f   :  { %v575_v40 = vmax.f32 %v573_v13, %v418_v27  ;;  %v452_v43 = vrot.slane %v451_v29, 1  ;;  %v549_v44 = vmax.f32 %v546_v16, %v548_v28  ;;  %642 = vst.msk [vmem:[%s1577_s1 + $0x28] sm:$0x1] %vm586_vm1, %v418_v27  ;;  %v591_v11 = vmax.f32 %v589_v31, %v974_v33 }
  0x70   :  { %v485_v30 = vmax.f32 %v483_v18, %v484_v32  ;;  %v517_v45 = vmax.f32 %v515_v20, %v516_v34  ;;  %v592_v10 = vmax.f32 %v590_v37, %v1364_v0  ;;  %v597_v23 = vmax.f32 %v595_v39, %v996_v49 }
  0x71   :  { %v453_v36 = vmax.f32 %v451_v29, %v452_v43  ;;  %v550_v47 = vrot.slane %v549_v44, 4  ;;  %593 = vst.msk [vmem:[%s1577_s1 + $0x1] sm:$0x1] %vm586_vm1, %v591_v11  ;;  %v596_v38 = vmax.f32 %v1297_v53, %v1318_v8  ;;  %v603_v58 = vmax.f32 %v1040_v19, %v1064_v42 }
  0x72   :  { %v486_v33 = vrot.slane %v485_v30, 1  ;;  %v518_v48 = vrot.slane %v517_v45, 2  ;;  %594 = vst.msk [vmem:[%s1577_s1 + $0x19] sm:$0x1] %vm586_vm1, %v592_v10  ;;  %v599_v49 = vmax.f32 %v597_v23, %v1008_v61  ;;  %v604_v0 = vmax.f32 %v1433_v5, %v1452_v17 }
  0x73   :  { %v577_v50 = vmax.f32 %v575_v40, %v453_v36  ;;  %v551_v51 = vmax.f32 %v549_v44, %v550_v47  ;;  %644 = vst.msk [vmem:[%s1577_s1 + $0x29] sm:$0x1] %vm586_vm1, %v453_v36  ;;  %v598_v19 = vmax.f32 %v596_v38, %v1386_v25  ;;  %v605_v42 = vmax.f32 %v603_v58, %v1136_v35 }
  0x74   :  { %v487_v53 = vmax.f32 %v485_v30, %v486_v33  ;;  %v519_v8 = vmax.f32 %v517_v45, %v518_v48  ;;  %601 = vst.msk [vmem:[%s1577_s1 + $0x2] sm:$0x1] %vm586_vm1, %v599_v49  ;;  %v606_v61 = vmax.f32 %v604_v0, %v453_v36  ;;  %v611_v5 = vmax.f32 %v1093_v6, %v1107_v21 }
  0x75   :  { %v552_v17 = vrot.slane %v551_v51, 2  ;;  %v600_v52 = vmax.f32 %v598_v19, %v1407_v46  ;;  %v607_v54 = vmax.f32 %v605_v42, %v1165_v60  ;;  %v612_v25 = vmax.f32 %v1480_v62, %v418_v27 }
  0x76   :  { %v579_v55 = vmax.f32 %v577_v50, %v487_v53  ;;  %v520_v35 = vrot.slane %v519_v8, 1  ;;  %646 = vst.msk [vmem:[%s1577_s1 + $0x2a] sm:$0x1] %vm586_vm1, %v487_v53  ;;  %v608_v56 = vmax.f32 %v606_v61, %v487_v53  ;;  %v613_v57 = vmax.f32 %v611_v5, %v1192_v24 }
  0x77   :  { %v553_v59 = vmax.f32 %v551_v51, %v552_v17  ;;  %602 = vst.msk [vmem:[%s1577_s1 + $0x1a] sm:$0x1] %vm586_vm1, %v600_v52  ;;  %609 = vst.msk [vmem:[%s1577_s1 + $0x3] sm:$0x1] %vm586_vm1, %v607_v54 }
  0x78   :  { %v521_v6 = vmax.f32 %v519_v8, %v520_v35  ;;  %610 = vst.msk [vmem:[%s1577_s1 + $0x1b] sm:$0x1] %vm586_vm1, %v608_v56  ;;  %v615_v21 = vmax.f32 %v613_v57, %v1212_v41 }
  0x79   :  { %v554_v60 = vrot.slane %v553_v59, 1 }
  0x7a   :  { %v581_v24 = vmax.f32 %v579_v55, %v521_v6  ;;  %648 = vst.msk [vmem:[%s1577_s1 + $0x2b] sm:$0x1] %vm586_vm1, %v521_v6  ;;  %617 = vst.msk [vmem:[%s1577_s1 + $0x4] sm:$0x1] %vm586_vm1, %v615_v21  ;;  %v614_v46 = vmax.f32 %v612_v25, %v521_v6 }
  0x7b   :  { %v555_v62 = vmax.f32 %v553_v59, %v554_v60 }
  0x7d   :  { %v583_v63 = vmax.f32 %v581_v24, %v555_v62  ;;  %650 = vst.msk [vmem:[%s1577_s1 + $0x2c] sm:$0x1] %vm586_vm1, %v555_v62  ;;  %v616_v41 = vmax.f32 %v614_v46, %v555_v62 }
  0x7f   :  { %v585_v1 = vmax.f32 %v583_v63, %v557_v26  ;;  %618 = vst.msk [vmem:[%s1577_s1 + $0x1c] sm:$0x1] %vm586_vm1, %v616_v41 }
  0x81   :  { %588 = vst.msk [vmem:[%s1577_s1 + $0x18] sm:$0x1] %vm586_vm1, %v585_v1 }

</bundles_post_ra>
